<compile_context>
chip_gen: v7x
topology: tpu7x:2x2x1
jax: 0.10.0
libtpu: 0.0.40
codegen_flags: <defaults>
</compile_context>

<pallas_src>
import functools

import jax
import jax.numpy as jnp
from jax.experimental import pallas as pl
from jax.experimental.pallas import tpu as pltpu

# ----------------------------- model sizes ---------------------------------
E = 2          # number of ensemble members (len(models) == len(cnn_models))
B = 8          # batch size
C = 4          # image channels
IMG = 16       # image spatial size
F_FEAT = 32    # cnn fc-feature size
D = 32         # input_encoding_size
H = 32         # rnn_size
V = 128        # vocab_size + 1 (logit output width)
T = 6          # seq length fed to forward (seq.size(1))


# --------------- Pallas kernel: fused T-step LSTM recurrence ----------------
def fused_ensemble_kernel(xs_ref, w_cat_ref, b_ref, w_logit_ref, b_logit_ref,
                          lp_ref):
    """One ensemble member per grid step.

    Runs the full T-step recurrence with h/c kept as loop-carried values,
    weights resident in VMEM, and per-step log_softmax written straight to the
    (T-1, B, V) output block. Step 0's logits are never materialized (they are
    discarded by the reference module and do not affect the recurrent state).
    """
    w_cat = w_cat_ref[0]        # (D+H, 4H) — [W_ih ; W_hh] pre-concatenated
    w_logit = w_logit_ref[0]    # (H, V)
    # hoist bias broadcasts out of the (unrolled) time loop
    b = jnp.broadcast_to(b_ref[0], (B, 4 * H))        # (B, 4H)
    b_logit = jnp.broadcast_to(b_logit_ref[0], (B, V))  # (B, V)

    h = jnp.zeros((B, H), jnp.float32)
    c = jnp.zeros((B, H), jnp.float32)

    for t in range(T):          # static unroll: T is small, gives LLO full view
        x = xs_ref[0, t]                                   # (B, D)
        xh = jnp.concatenate([x, h], axis=1)               # (B, D+H) = (8, 64)
        gates = jnp.dot(xh, w_cat,
                        preferred_element_type=jnp.float32) + b   # (B, 4H)

        # full-width EUP passes over the (8,128) gates vreg, then slice
        sg = jax.nn.sigmoid(gates)
        tg = jnp.tanh(gates)
        i_g = sg[:, 0 * H:1 * H]
        f_g = sg[:, 1 * H:2 * H]
        g_g = tg[:, 2 * H:3 * H]
        o_g = sg[:, 3 * H:4 * H]

        c = f_g * c + i_g * g_g
        h = o_g * jnp.tanh(c)

        if t >= 1:
            logits = jnp.dot(h, w_logit,
                             preferred_element_type=jnp.float32) + b_logit  # (B, V)
            m = jnp.max(logits, axis=-1, keepdims=True)
            z = logits - m
            lse = jnp.log(jnp.sum(jnp.exp(z), axis=-1, keepdims=True))
            lp_ref[0, t - 1] = z - lse                     # lane-dense (8, 128) store


def ensemble_recurrence(xs, w_cat, b, w_logit, b_logit):
    return pl.pallas_call(
        fused_ensemble_kernel,
        out_shape=jax.ShapeDtypeStruct((E, T - 1, B, V), jnp.float32),
        grid=(E,),
        in_specs=[
            pl.BlockSpec((1, T, B, D), lambda e: (e, 0, 0, 0)),
            pl.BlockSpec((1, D + H, 4 * H), lambda e: (e, 0, 0)),
            pl.BlockSpec((1, 1, 4 * H), lambda e: (e, 0, 0)),
            pl.BlockSpec((1, H, V), lambda e: (e, 0, 0)),
            pl.BlockSpec((1, 1, V), lambda e: (e, 0, 0)),
        ],
        out_specs=pl.BlockSpec((1, T - 1, B, V), lambda e: (e, 0, 0, 0)),
        compiler_params=pltpu.CompilerParams(
            dimension_semantics=("parallel",)),   # v7x: shard members over 2 TCs
    )(xs, w_cat, b, w_logit, b_logit)


# ------------------------------ parameters ----------------------------------
def make_params(key):
    ks = jax.random.split(key, 9)
    s = 0.1
    w_ih = jax.random.normal(ks[5], (E, D, 4 * H), jnp.float32) * s
    w_hh = jax.random.normal(ks[6], (E, H, 4 * H), jnp.float32) * s
    params = {
        # synthetic "cnn_model.forward_caps": mean-pool + linear -> fc_feats
        "w_cnn": jax.random.normal(ks[0], (E, C, F_FEAT), jnp.float32) * s,
        "b_cnn": jax.random.normal(ks[1], (E, 1, F_FEAT), jnp.float32) * s,
        # model.img_embed : Linear(F_FEAT, D)
        "w_img": jax.random.normal(ks[2], (E, F_FEAT, D), jnp.float32) * s,
        "b_img": jax.random.normal(ks[3], (E, 1, D), jnp.float32) * s,
        # model.embed : Embedding(V, D)
        "embed": jax.random.normal(ks[4], (E, V, D), jnp.float32) * s,
        # model.core : LSTM(D, H) — [W_ih ; W_hh] concatenated, b = b_ih + b_hh
        "w_cat": jnp.concatenate([w_ih, w_hh], axis=1),   # (E, D+H, 4H)
        "b": jax.random.normal(ks[7], (E, 1, 4 * H), jnp.float32) * s,
        # model.logit : Linear(H, V)
        "w_logit": jax.random.normal(ks[8], (E, H, V), jnp.float32) * s,
        "b_logit": jnp.zeros((E, 1, V), jnp.float32),
    }
    return params


# ------------------------------ forward pass --------------------------------
@functools.partial(jax.jit, static_argnames=())
def ensemble_forward(images, seq, params):
    """Ensemble.forward(images, seq) with ensemble_mode='mean', ss_prob=0."""
    # ---- get_feats glue ("cnn_model.forward_caps"): mean-pool NCHW + linear
    pooled = jnp.mean(images, axis=(2, 3))                          # (B, C)
    fc_feats = (jnp.einsum("bc,ecf->ebf", pooled, params["w_cnn"])
                + params["b_cnn"])                                  # (E, B, F)

    # ---- t=0 input: model.img_embed(fc_feats)
    x0 = (jnp.einsum("ebf,efd->ebd", fc_feats, params["w_img"])
          + params["b_img"])                                        # (E, B, D)

    # ---- t>=1 inputs: gather ALL token embeddings once (hoisted out of loop).
    # model.drop_x_lm is identity in eval (ss_prob=0).
    tok = seq[:, :T - 1]                                            # (B, T-1)
    emb = jnp.take(params["embed"], tok, axis=1)                    # (E, B, T-1, D)
    emb = jnp.transpose(emb, (0, 2, 1, 3))                          # (E, T-1, B, D)
    xs = jnp.concatenate([x0[:, None], emb], axis=1)                # (E, T, B, D)
    # TODO(synk): data-dependent early `break` when seq[:, i-1].sum()==0 is not
    # expressible with static shapes; inputs here use nonzero tokens.

    # ---- fused recurrence: all T steps, all E members, one pallas_call
    lp = ensemble_recurrence(xs, params["w_cat"], params["b"],
                             params["w_logit"], params["b_logit"])  # (E, T-1, B, V)

    # ---- ensemble_mode == 'mean': mean of log-probs over the (E=2) models.
    # Done in plain JAX (trivial size; avoids a race across the parallel E axis).
    mean_lp = jnp.mean(lp, axis=0)                                  # (T-1, B, V)
    return jnp.transpose(mean_lp, (1, 0, 2))                        # (B, T-1, V)


# ---------------------------------- main -------------------------------------
if __name__ == "__main__":
    key = jax.random.PRNGKey(0)
    k_img, k_seq, k_par = jax.random.split(key, 3)

    images = jax.random.normal(k_img, (B, C, IMG, IMG), jnp.float32)   # NCHW
    # tokens in [1, V-1] so the original early-break path never triggers
    seq = jax.random.randint(k_seq, (B, T), 1, V, dtype=jnp.int32)
    params = make_params(k_par)

    out = ensemble_forward(images, seq, params)
    out = jax.block_until_ready(out)

    assert out.shape == (B, T - 1, V), out.shape
    # each row of the mean-of-log-softmax should be finite
    assert bool(jnp.all(jnp.isfinite(out)))
    print("KERNEL_OK")
</pallas_src>

<mosaic_0001>
module attributes {stable_mosaic.version = 11 : i64} {
  func.func @fused_ensemble_kernel(%arg0: i32, %arg1: memref<1x6x8x32xf32, #tpu.memory_space<vmem>>, %arg2: memref<1x64x128xf32, #tpu.memory_space<vmem>>, %arg3: memref<1x1x128xf32, #tpu.memory_space<vmem>>, %arg4: memref<1x32x128xf32, #tpu.memory_space<vmem>>, %arg5: memref<1x1x128xf32, #tpu.memory_space<vmem>>, %arg6: memref<1x5x8x128xf32, #tpu.memory_space<vmem>>) attributes {dimension_semantics = [#tpu.dimension_semantics<parallel>], iteration_bounds = array<i64: 2>, scalar_prefetch = 0 : i64, scratch_operands = 0 : i64, tpu.core_type = #tpu.core_type<tc>, window_params = [{transform_indices = @transform_0, window_bounds = array<i64: 1, 6, 8, 32>}, {transform_indices = @transform_1, window_bounds = array<i64: 1, 64, 128>}, {transform_indices = @transform_2, window_bounds = array<i64: 1, 1, 128>}, {transform_indices = @transform_3, window_bounds = array<i64: 1, 32, 128>}, {transform_indices = @transform_4, window_bounds = array<i64: 1, 1, 128>}, {transform_indices = @transform_5, window_bounds = array<i64: 1, 5, 8, 128>}]} {
    %c0 = arith.constant 0 : index
    %c0_0 = arith.constant 0 : index
    %c0_1 = arith.constant 0 : index
    %0 = vector.load %arg2[%c0, %c0_0, %c0_1] : memref<1x64x128xf32, #tpu.memory_space<vmem>>, vector<1x64x128xf32>
    %1 = vector.shape_cast %0 : vector<1x64x128xf32> to vector<64x128xf32>
    %c0_2 = arith.constant 0 : index
    %c0_3 = arith.constant 0 : index
    %c0_4 = arith.constant 0 : index
    %2 = vector.load %arg4[%c0_2, %c0_3, %c0_4] : memref<1x32x128xf32, #tpu.memory_space<vmem>>, vector<1x32x128xf32>
    %3 = vector.shape_cast %2 : vector<1x32x128xf32> to vector<32x128xf32>
    %c0_5 = arith.constant 0 : index
    %c0_6 = arith.constant 0 : index
    %c0_7 = arith.constant 0 : index
    %4 = vector.load %arg3[%c0_5, %c0_6, %c0_7] : memref<1x1x128xf32, #tpu.memory_space<vmem>>, vector<1x1x128xf32>
    %5 = vector.shape_cast %4 : vector<1x1x128xf32> to vector<1x128xf32>
    %6 = vector.shape_cast %5 : vector<1x128xf32> to vector<1x128xf32>
    %7 = vector.broadcast %6 : vector<1x128xf32> to vector<8x128xf32>
    %c0_8 = arith.constant 0 : index
    %c0_9 = arith.constant 0 : index
    %c0_10 = arith.constant 0 : index
    %8 = vector.load %arg5[%c0_8, %c0_9, %c0_10] : memref<1x1x128xf32, #tpu.memory_space<vmem>>, vector<1x1x128xf32>
    %9 = vector.shape_cast %8 : vector<1x1x128xf32> to vector<1x128xf32>
    %10 = vector.shape_cast %9 : vector<1x128xf32> to vector<1x128xf32>
    %11 = vector.broadcast %10 : vector<1x128xf32> to vector<8x128xf32>
    %cst = arith.constant 0.000000e+00 : f32
    %12 = vector.broadcast %cst : f32 to vector<8x32xf32>
    %cst_11 = arith.constant 0.000000e+00 : f32
    %13 = vector.broadcast %cst_11 : f32 to vector<8x32xf32>
    %c0_12 = arith.constant 0 : index
    %c0_13 = arith.constant 0 : index
    %c0_14 = arith.constant 0 : index
    %c0_15 = arith.constant 0 : index
    %14 = vector.load %arg1[%c0_12, %c0_13, %c0_14, %c0_15] : memref<1x6x8x32xf32, #tpu.memory_space<vmem>>, vector<1x1x8x32xf32>
    %15 = vector.shape_cast %14 : vector<1x1x8x32xf32> to vector<8x32xf32>
    %16 = tpu.concatenate %15, %12 in 1 : vector<8x32xf32>, vector<8x32xf32> -> vector<8x64xf32>
    %cst_16 = arith.constant dense<0.000000e+00> : vector<8x128xf32>
    %17 = tpu.matmul %16, %1, %cst_16 {dimension_numbers = #tpu.dot_dimension_numbers<[1], [0], [0], [1], [0, 0, 1, 1], [], []>} : vector<8x64xf32>, vector<64x128xf32>, vector<8x128xf32> -> vector<8x128xf32>
    %18 = arith.addf %17, %7 : vector<8x128xf32>
    %19 = arith.negf %18 : vector<8x128xf32>
    %20 = math.exp %19 : vector<8x128xf32>
    %cst_17 = arith.constant 1.000000e+00 : f32
    %21 = vector.broadcast %cst_17 : f32 to vector<8x128xf32>
    %22 = arith.addf %21, %20 : vector<8x128xf32>
    %23 = arith.divf %21, %22 : vector<8x128xf32>
    %24 = math.tanh %18 : vector<8x128xf32>
    %25 = vector.extract_strided_slice %23 {offsets = [0, 0], sizes = [8, 32], strides = [1, 1]} : vector<8x128xf32> to vector<8x32xf32>
    %26 = vector.extract_strided_slice %23 {offsets = [0, 32], sizes = [8, 32], strides = [1, 1]} : vector<8x128xf32> to vector<8x32xf32>
    %27 = vector.extract_strided_slice %24 {offsets = [0, 64], sizes = [8, 32], strides = [1, 1]} : vector<8x128xf32> to vector<8x32xf32>
    %28 = vector.extract_strided_slice %23 {offsets = [0, 96], sizes = [8, 32], strides = [1, 1]} : vector<8x128xf32> to vector<8x32xf32>
    %29 = arith.mulf %26, %13 : vector<8x32xf32>
    %30 = arith.mulf %25, %27 : vector<8x32xf32>
    %31 = arith.addf %29, %30 : vector<8x32xf32>
    %32 = math.tanh %31 : vector<8x32xf32>
    %33 = arith.mulf %28, %32 : vector<8x32xf32>
    %c0_18 = arith.constant 0 : index
    %c1 = arith.constant 1 : index
    %c0_19 = arith.constant 0 : index
    %c0_20 = arith.constant 0 : index
    %34 = vector.load %arg1[%c0_18, %c1, %c0_19, %c0_20] : memref<1x6x8x32xf32, #tpu.memory_space<vmem>>, vector<1x1x8x32xf32>
    %35 = vector.shape_cast %34 : vector<1x1x8x32xf32> to vector<8x32xf32>
    %36 = tpu.concatenate %35, %33 in 1 : vector<8x32xf32>, vector<8x32xf32> -> vector<8x64xf32>
    %cst_21 = arith.constant dense<0.000000e+00> : vector<8x128xf32>
    %37 = tpu.matmul %36, %1, %cst_21 {dimension_numbers = #tpu.dot_dimension_numbers<[1], [0], [0], [1], [0, 0, 1, 1], [], []>} : vector<8x64xf32>, vector<64x128xf32>, vector<8x128xf32> -> vector<8x128xf32>
    %38 = arith.addf %37, %7 : vector<8x128xf32>
    %39 = arith.negf %38 : vector<8x128xf32>
    %40 = math.exp %39 : vector<8x128xf32>
    %cst_22 = arith.constant 1.000000e+00 : f32
    %41 = vector.broadcast %cst_22 : f32 to vector<8x128xf32>
    %42 = arith.addf %41, %40 : vector<8x128xf32>
    %43 = arith.divf %41, %42 : vector<8x128xf32>
    %44 = math.tanh %38 : vector<8x128xf32>
    %45 = vector.extract_strided_slice %43 {offsets = [0, 0], sizes = [8, 32], strides = [1, 1]} : vector<8x128xf32> to vector<8x32xf32>
    %46 = vector.extract_strided_slice %43 {offsets = [0, 32], sizes = [8, 32], strides = [1, 1]} : vector<8x128xf32> to vector<8x32xf32>
    %47 = vector.extract_strided_slice %44 {offsets = [0, 64], sizes = [8, 32], strides = [1, 1]} : vector<8x128xf32> to vector<8x32xf32>
    %48 = vector.extract_strided_slice %43 {offsets = [0, 96], sizes = [8, 32], strides = [1, 1]} : vector<8x128xf32> to vector<8x32xf32>
    %49 = arith.mulf %46, %31 : vector<8x32xf32>
    %50 = arith.mulf %45, %47 : vector<8x32xf32>
    %51 = arith.addf %49, %50 : vector<8x32xf32>
    %52 = math.tanh %51 : vector<8x32xf32>
    %53 = arith.mulf %48, %52 : vector<8x32xf32>
    %cst_23 = arith.constant dense<0.000000e+00> : vector<8x128xf32>
    %54 = tpu.matmul %53, %3, %cst_23 {dimension_numbers = #tpu.dot_dimension_numbers<[1], [0], [0], [1], [0, 0, 1, 1], [], []>} : vector<8x32xf32>, vector<32x128xf32>, vector<8x128xf32> -> vector<8x128xf32>
    %55 = arith.addf %54, %11 : vector<8x128xf32>
    %cst_24 = arith.constant dense<0xFF800000> : vector<8xf32>
    %56 = vector.multi_reduction <maximumf>, %55, %cst_24 [1] : vector<8x128xf32> to vector<8xf32>
    %57 = vector.shape_cast %56 : vector<8xf32> to vector<8x1xf32>
    %58 = vector.broadcast %57 : vector<8x1xf32> to vector<8x128xf32>
    %59 = arith.subf %55, %58 : vector<8x128xf32>
    %60 = math.exp %59 : vector<8x128xf32>
    %cst_25 = arith.constant dense<0.000000e+00> : vector<8xf32>
    %61 = vector.multi_reduction <add>, %60, %cst_25 [1] : vector<8x128xf32> to vector<8xf32>
    %62 = vector.shape_cast %61 : vector<8xf32> to vector<8x1xf32>
    %63 = math.log %62 : vector<8x1xf32>
    %64 = vector.broadcast %63 : vector<8x1xf32> to vector<8x128xf32>
    %65 = arith.subf %59, %64 : vector<8x128xf32>
    %c0_26 = arith.constant 0 : index
    %c0_27 = arith.constant 0 : index
    %c0_28 = arith.constant 0 : index
    %c0_29 = arith.constant 0 : index
    %66 = vector.load %arg6[%c0_26, %c0_27, %c0_28, %c0_29] : memref<1x5x8x128xf32, #tpu.memory_space<vmem>>, vector<1x1x8x128xf32>
    %67 = vector.shape_cast %66 : vector<1x1x8x128xf32> to vector<8x128xf32>
    %68 = vector.shape_cast %65 : vector<8x128xf32> to vector<1x1x8x128xf32>
    tpu.vector_store %arg6[%c0_26, %c0_27, %c0_28, %c0_29], %68 {strides = array<i32>} : memref<1x5x8x128xf32, #tpu.memory_space<vmem>>, vector<1x1x8x128xf32>,
    %c0_30 = arith.constant 0 : index
    %c2 = arith.constant 2 : index
    %c0_31 = arith.constant 0 : index
    %c0_32 = arith.constant 0 : index
    %69 = vector.load %arg1[%c0_30, %c2, %c0_31, %c0_32] : memref<1x6x8x32xf32, #tpu.memory_space<vmem>>, vector<1x1x8x32xf32>
    %70 = vector.shape_cast %69 : vector<1x1x8x32xf32> to vector<8x32xf32>
    %71 = tpu.concatenate %70, %53 in 1 : vector<8x32xf32>, vector<8x32xf32> -> vector<8x64xf32>
    %cst_33 = arith.constant dense<0.000000e+00> : vector<8x128xf32>
    %72 = tpu.matmul %71, %1, %cst_33 {dimension_numbers = #tpu.dot_dimension_numbers<[1], [0], [0], [1], [0, 0, 1, 1], [], []>} : vector<8x64xf32>, vector<64x128xf32>, vector<8x128xf32> -> vector<8x128xf32>
    %73 = arith.addf %72, %7 : vector<8x128xf32>
    %74 = arith.negf %73 : vector<8x128xf32>
    %75 = math.exp %74 : vector<8x128xf32>
    %cst_34 = arith.constant 1.000000e+00 : f32
    %76 = vector.broadcast %cst_34 : f32 to vector<8x128xf32>
    %77 = arith.addf %76, %75 : vector<8x128xf32>
    %78 = arith.divf %76, %77 : vector<8x128xf32>
    %79 = math.tanh %73 : vector<8x128xf32>
    %80 = vector.extract_strided_slice %78 {offsets = [0, 0], sizes = [8, 32], strides = [1, 1]} : vector<8x128xf32> to vector<8x32xf32>
    %81 = vector.extract_strided_slice %78 {offsets = [0, 32], sizes = [8, 32], strides = [1, 1]} : vector<8x128xf32> to vector<8x32xf32>
    %82 = vector.extract_strided_slice %79 {offsets = [0, 64], sizes = [8, 32], strides = [1, 1]} : vector<8x128xf32> to vector<8x32xf32>
    %83 = vector.extract_strided_slice %78 {offsets = [0, 96], sizes = [8, 32], strides = [1, 1]} : vector<8x128xf32> to vector<8x32xf32>
    %84 = arith.mulf %81, %51 : vector<8x32xf32>
    %85 = arith.mulf %80, %82 : vector<8x32xf32>
    %86 = arith.addf %84, %85 : vector<8x32xf32>
    %87 = math.tanh %86 : vector<8x32xf32>
    %88 = arith.mulf %83, %87 : vector<8x32xf32>
    %cst_35 = arith.constant dense<0.000000e+00> : vector<8x128xf32>
    %89 = tpu.matmul %88, %3, %cst_35 {dimension_numbers = #tpu.dot_dimension_numbers<[1], [0], [0], [1], [0, 0, 1, 1], [], []>} : vector<8x32xf32>, vector<32x128xf32>, vector<8x128xf32> -> vector<8x128xf32>
    %90 = arith.addf %89, %11 : vector<8x128xf32>
    %cst_36 = arith.constant dense<0xFF800000> : vector<8xf32>
    %91 = vector.multi_reduction <maximumf>, %90, %cst_36 [1] : vector<8x128xf32> to vector<8xf32>
    %92 = vector.shape_cast %91 : vector<8xf32> to vector<8x1xf32>
    %93 = vector.broadcast %92 : vector<8x1xf32> to vector<8x128xf32>
    %94 = arith.subf %90, %93 : vector<8x128xf32>
    %95 = math.exp %94 : vector<8x128xf32>
    %cst_37 = arith.constant dense<0.000000e+00> : vector<8xf32>
    %96 = vector.multi_reduction <add>, %95, %cst_37 [1] : vector<8x128xf32> to vector<8xf32>
    %97 = vector.shape_cast %96 : vector<8xf32> to vector<8x1xf32>
    %98 = math.log %97 : vector<8x1xf32>
    %99 = vector.broadcast %98 : vector<8x1xf32> to vector<8x128xf32>
    %100 = arith.subf %94, %99 : vector<8x128xf32>
    %c0_38 = arith.constant 0 : index
    %c1_39 = arith.constant 1 : index
    %c0_40 = arith.constant 0 : index
    %c0_41 = arith.constant 0 : index
    %101 = vector.load %arg6[%c0_38, %c1_39, %c0_40, %c0_41] : memref<1x5x8x128xf32, #tpu.memory_space<vmem>>, vector<1x1x8x128xf32>
    %102 = vector.shape_cast %101 : vector<1x1x8x128xf32> to vector<8x128xf32>
    %103 = vector.shape_cast %100 : vector<8x128xf32> to vector<1x1x8x128xf32>
    tpu.vector_store %arg6[%c0_38, %c1_39, %c0_40, %c0_41], %103 {strides = array<i32>} : memref<1x5x8x128xf32, #tpu.memory_space<vmem>>, vector<1x1x8x128xf32>,
    %c0_42 = arith.constant 0 : index
    %c3 = arith.constant 3 : index
    %c0_43 = arith.constant 0 : index
    %c0_44 = arith.constant 0 : index
    %104 = vector.load %arg1[%c0_42, %c3, %c0_43, %c0_44] : memref<1x6x8x32xf32, #tpu.memory_space<vmem>>, vector<1x1x8x32xf32>
    %105 = vector.shape_cast %104 : vector<1x1x8x32xf32> to vector<8x32xf32>
    %106 = tpu.concatenate %105, %88 in 1 : vector<8x32xf32>, vector<8x32xf32> -> vector<8x64xf32>
    %cst_45 = arith.constant dense<0.000000e+00> : vector<8x128xf32>
    %107 = tpu.matmul %106, %1, %cst_45 {dimension_numbers = #tpu.dot_dimension_numbers<[1], [0], [0], [1], [0, 0, 1, 1], [], []>} : vector<8x64xf32>, vector<64x128xf32>, vector<8x128xf32> -> vector<8x128xf32>
    %108 = arith.addf %107, %7 : vector<8x128xf32>
    %109 = arith.negf %108 : vector<8x128xf32>
    %110 = math.exp %109 : vector<8x128xf32>
    %cst_46 = arith.constant 1.000000e+00 : f32
    %111 = vector.broadcast %cst_46 : f32 to vector<8x128xf32>
    %112 = arith.addf %111, %110 : vector<8x128xf32>
    %113 = arith.divf %111, %112 : vector<8x128xf32>
    %114 = math.tanh %108 : vector<8x128xf32>
    %115 = vector.extract_strided_slice %113 {offsets = [0, 0], sizes = [8, 32], strides = [1, 1]} : vector<8x128xf32> to vector<8x32xf32>
    %116 = vector.extract_strided_slice %113 {offsets = [0, 32], sizes = [8, 32], strides = [1, 1]} : vector<8x128xf32> to vector<8x32xf32>
    %117 = vector.extract_strided_slice %114 {offsets = [0, 64], sizes = [8, 32], strides = [1, 1]} : vector<8x128xf32> to vector<8x32xf32>
    %118 = vector.extract_strided_slice %113 {offsets = [0, 96], sizes = [8, 32], strides = [1, 1]} : vector<8x128xf32> to vector<8x32xf32>
    %119 = arith.mulf %116, %86 : vector<8x32xf32>
    %120 = arith.mulf %115, %117 : vector<8x32xf32>
    %121 = arith.addf %119, %120 : vector<8x32xf32>
    %122 = math.tanh %121 : vector<8x32xf32>
    %123 = arith.mulf %118, %122 : vector<8x32xf32>
    %cst_47 = arith.constant dense<0.000000e+00> : vector<8x128xf32>
    %124 = tpu.matmul %123, %3, %cst_47 {dimension_numbers = #tpu.dot_dimension_numbers<[1], [0], [0], [1], [0, 0, 1, 1], [], []>} : vector<8x32xf32>, vector<32x128xf32>, vector<8x128xf32> -> vector<8x128xf32>
    %125 = arith.addf %124, %11 : vector<8x128xf32>
    %cst_48 = arith.constant dense<0xFF800000> : vector<8xf32>
    %126 = vector.multi_reduction <maximumf>, %125, %cst_48 [1] : vector<8x128xf32> to vector<8xf32>
    %127 = vector.shape_cast %126 : vector<8xf32> to vector<8x1xf32>
    %128 = vector.broadcast %127 : vector<8x1xf32> to vector<8x128xf32>
    %129 = arith.subf %125, %128 : vector<8x128xf32>
    %130 = math.exp %129 : vector<8x128xf32>
    %cst_49 = arith.constant dense<0.000000e+00> : vector<8xf32>
    %131 = vector.multi_reduction <add>, %130, %cst_49 [1] : vector<8x128xf32> to vector<8xf32>
    %132 = vector.shape_cast %131 : vector<8xf32> to vector<8x1xf32>
    %133 = math.log %132 : vector<8x1xf32>
    %134 = vector.broadcast %133 : vector<8x1xf32> to vector<8x128xf32>
    %135 = arith.subf %129, %134 : vector<8x128xf32>
    %c0_50 = arith.constant 0 : index
    %c2_51 = arith.constant 2 : index
    %c0_52 = arith.constant 0 : index
    %c0_53 = arith.constant 0 : index
    %136 = vector.load %arg6[%c0_50, %c2_51, %c0_52, %c0_53] : memref<1x5x8x128xf32, #tpu.memory_space<vmem>>, vector<1x1x8x128xf32>
    %137 = vector.shape_cast %136 : vector<1x1x8x128xf32> to vector<8x128xf32>
    %138 = vector.shape_cast %135 : vector<8x128xf32> to vector<1x1x8x128xf32>
    tpu.vector_store %arg6[%c0_50, %c2_51, %c0_52, %c0_53], %138 {strides = array<i32>} : memref<1x5x8x128xf32, #tpu.memory_space<vmem>>, vector<1x1x8x128xf32>,
    %c0_54 = arith.constant 0 : index
    %c4 = arith.constant 4 : index
    %c0_55 = arith.constant 0 : index
    %c0_56 = arith.constant 0 : index
    %139 = vector.load %arg1[%c0_54, %c4, %c0_55, %c0_56] : memref<1x6x8x32xf32, #tpu.memory_space<vmem>>, vector<1x1x8x32xf32>
    %140 = vector.shape_cast %139 : vector<1x1x8x32xf32> to vector<8x32xf32>
    %141 = tpu.concatenate %140, %123 in 1 : vector<8x32xf32>, vector<8x32xf32> -> vector<8x64xf32>
    %cst_57 = arith.constant dense<0.000000e+00> : vector<8x128xf32>
    %142 = tpu.matmul %141, %1, %cst_57 {dimension_numbers = #tpu.dot_dimension_numbers<[1], [0], [0], [1], [0, 0, 1, 1], [], []>} : vector<8x64xf32>, vector<64x128xf32>, vector<8x128xf32> -> vector<8x128xf32>
    %143 = arith.addf %142, %7 : vector<8x128xf32>
    %144 = arith.negf %143 : vector<8x128xf32>
    %145 = math.exp %144 : vector<8x128xf32>
    %cst_58 = arith.constant 1.000000e+00 : f32
    %146 = vector.broadcast %cst_58 : f32 to vector<8x128xf32>
    %147 = arith.addf %146, %145 : vector<8x128xf32>
    %148 = arith.divf %146, %147 : vector<8x128xf32>
    %149 = math.tanh %143 : vector<8x128xf32>
    %150 = vector.extract_strided_slice %148 {offsets = [0, 0], sizes = [8, 32], strides = [1, 1]} : vector<8x128xf32> to vector<8x32xf32>
    %151 = vector.extract_strided_slice %148 {offsets = [0, 32], sizes = [8, 32], strides = [1, 1]} : vector<8x128xf32> to vector<8x32xf32>
    %152 = vector.extract_strided_slice %149 {offsets = [0, 64], sizes = [8, 32], strides = [1, 1]} : vector<8x128xf32> to vector<8x32xf32>
    %153 = vector.extract_strided_slice %148 {offsets = [0, 96], sizes = [8, 32], strides = [1, 1]} : vector<8x128xf32> to vector<8x32xf32>
    %154 = arith.mulf %151, %121 : vector<8x32xf32>
    %155 = arith.mulf %150, %152 : vector<8x32xf32>
    %156 = arith.addf %154, %155 : vector<8x32xf32>
    %157 = math.tanh %156 : vector<8x32xf32>
    %158 = arith.mulf %153, %157 : vector<8x32xf32>
    %cst_59 = arith.constant dense<0.000000e+00> : vector<8x128xf32>
    %159 = tpu.matmul %158, %3, %cst_59 {dimension_numbers = #tpu.dot_dimension_numbers<[1], [0], [0], [1], [0, 0, 1, 1], [], []>} : vector<8x32xf32>, vector<32x128xf32>, vector<8x128xf32> -> vector<8x128xf32>
    %160 = arith.addf %159, %11 : vector<8x128xf32>
    %cst_60 = arith.constant dense<0xFF800000> : vector<8xf32>
    %161 = vector.multi_reduction <maximumf>, %160, %cst_60 [1] : vector<8x128xf32> to vector<8xf32>
    %162 = vector.shape_cast %161 : vector<8xf32> to vector<8x1xf32>
    %163 = vector.broadcast %162 : vector<8x1xf32> to vector<8x128xf32>
    %164 = arith.subf %160, %163 : vector<8x128xf32>
    %165 = math.exp %164 : vector<8x128xf32>
    %cst_61 = arith.constant dense<0.000000e+00> : vector<8xf32>
    %166 = vector.multi_reduction <add>, %165, %cst_61 [1] : vector<8x128xf32> to vector<8xf32>
    %167 = vector.shape_cast %166 : vector<8xf32> to vector<8x1xf32>
    %168 = math.log %167 : vector<8x1xf32>
    %169 = vector.broadcast %168 : vector<8x1xf32> to vector<8x128xf32>
    %170 = arith.subf %164, %169 : vector<8x128xf32>
    %c0_62 = arith.constant 0 : index
    %c3_63 = arith.constant 3 : index
    %c0_64 = arith.constant 0 : index
    %c0_65 = arith.constant 0 : index
    %171 = vector.load %arg6[%c0_62, %c3_63, %c0_64, %c0_65] : memref<1x5x8x128xf32, #tpu.memory_space<vmem>>, vector<1x1x8x128xf32>
    %172 = vector.shape_cast %171 : vector<1x1x8x128xf32> to vector<8x128xf32>
    %173 = vector.shape_cast %170 : vector<8x128xf32> to vector<1x1x8x128xf32>
    tpu.vector_store %arg6[%c0_62, %c3_63, %c0_64, %c0_65], %173 {strides = array<i32>} : memref<1x5x8x128xf32, #tpu.memory_space<vmem>>, vector<1x1x8x128xf32>,
    %c0_66 = arith.constant 0 : index
    %c5 = arith.constant 5 : index
    %c0_67 = arith.constant 0 : index
    %c0_68 = arith.constant 0 : index
    %174 = vector.load %arg1[%c0_66, %c5, %c0_67, %c0_68] : memref<1x6x8x32xf32, #tpu.memory_space<vmem>>, vector<1x1x8x32xf32>
    %175 = vector.shape_cast %174 : vector<1x1x8x32xf32> to vector<8x32xf32>
    %176 = tpu.concatenate %175, %158 in 1 : vector<8x32xf32>, vector<8x32xf32> -> vector<8x64xf32>
    %cst_69 = arith.constant dense<0.000000e+00> : vector<8x128xf32>
    %177 = tpu.matmul %176, %1, %cst_69 {dimension_numbers = #tpu.dot_dimension_numbers<[1], [0], [0], [1], [0, 0, 1, 1], [], []>} : vector<8x64xf32>, vector<64x128xf32>, vector<8x128xf32> -> vector<8x128xf32>
    %178 = arith.addf %177, %7 : vector<8x128xf32>
    %179 = arith.negf %178 : vector<8x128xf32>
    %180 = math.exp %179 : vector<8x128xf32>
    %cst_70 = arith.constant 1.000000e+00 : f32
    %181 = vector.broadcast %cst_70 : f32 to vector<8x128xf32>
    %182 = arith.addf %181, %180 : vector<8x128xf32>
    %183 = arith.divf %181, %182 : vector<8x128xf32>
    %184 = math.tanh %178 : vector<8x128xf32>
    %185 = vector.extract_strided_slice %183 {offsets = [0, 0], sizes = [8, 32], strides = [1, 1]} : vector<8x128xf32> to vector<8x32xf32>
    %186 = vector.extract_strided_slice %183 {offsets = [0, 32], sizes = [8, 32], strides = [1, 1]} : vector<8x128xf32> to vector<8x32xf32>
    %187 = vector.extract_strided_slice %184 {offsets = [0, 64], sizes = [8, 32], strides = [1, 1]} : vector<8x128xf32> to vector<8x32xf32>
    %188 = vector.extract_strided_slice %183 {offsets = [0, 96], sizes = [8, 32], strides = [1, 1]} : vector<8x128xf32> to vector<8x32xf32>
    %189 = arith.mulf %186, %156 : vector<8x32xf32>
    %190 = arith.mulf %185, %187 : vector<8x32xf32>
    %191 = arith.addf %189, %190 : vector<8x32xf32>
    %192 = math.tanh %191 : vector<8x32xf32>
    %193 = arith.mulf %188, %192 : vector<8x32xf32>
    %cst_71 = arith.constant dense<0.000000e+00> : vector<8x128xf32>
    %194 = tpu.matmul %193, %3, %cst_71 {dimension_numbers = #tpu.dot_dimension_numbers<[1], [0], [0], [1], [0, 0, 1, 1], [], []>} : vector<8x32xf32>, vector<32x128xf32>, vector<8x128xf32> -> vector<8x128xf32>
    %195 = arith.addf %194, %11 : vector<8x128xf32>
    %cst_72 = arith.constant dense<0xFF800000> : vector<8xf32>
    %196 = vector.multi_reduction <maximumf>, %195, %cst_72 [1] : vector<8x128xf32> to vector<8xf32>
    %197 = vector.shape_cast %196 : vector<8xf32> to vector<8x1xf32>
    %198 = vector.broadcast %197 : vector<8x1xf32> to vector<8x128xf32>
    %199 = arith.subf %195, %198 : vector<8x128xf32>
    %200 = math.exp %199 : vector<8x128xf32>
    %cst_73 = arith.constant dense<0.000000e+00> : vector<8xf32>
    %201 = vector.multi_reduction <add>, %200, %cst_73 [1] : vector<8x128xf32> to vector<8xf32>
    %202 = vector.shape_cast %201 : vector<8xf32> to vector<8x1xf32>
    %203 = math.log %202 : vector<8x1xf32>
    %204 = vector.broadcast %203 : vector<8x1xf32> to vector<8x128xf32>
    %205 = arith.subf %199, %204 : vector<8x128xf32>
    %c0_74 = arith.constant 0 : index
    %c4_75 = arith.constant 4 : index
    %c0_76 = arith.constant 0 : index
    %c0_77 = arith.constant 0 : index
    %206 = vector.load %arg6[%c0_74, %c4_75, %c0_76, %c0_77] : memref<1x5x8x128xf32, #tpu.memory_space<vmem>>, vector<1x1x8x128xf32>
    %207 = vector.shape_cast %206 : vector<1x1x8x128xf32> to vector<8x128xf32>
    %208 = vector.shape_cast %205 : vector<8x128xf32> to vector<1x1x8x128xf32>
    tpu.vector_store %arg6[%c0_74, %c4_75, %c0_76, %c0_77], %208 {strides = array<i32>} : memref<1x5x8x128xf32, #tpu.memory_space<vmem>>, vector<1x1x8x128xf32>,
    return
  }
  func.func @transform_0(%arg0: i32) -> (i32, i32, i32, i32) {
    %c0_i32 = arith.constant 0 : i32
    %c0_i32_0 = arith.constant 0 : i32
    %c0_i32_1 = arith.constant 0 : i32
    %c0_i32_2 = arith.constant 0 : i32
    return %arg0, %c0_i32, %c0_i32_0, %c0_i32_1 : i32, i32, i32, i32
  }
  func.func @transform_1(%arg0: i32) -> (i32, i32, i32) {
    %c0_i32 = arith.constant 0 : i32
    %c0_i32_0 = arith.constant 0 : i32
    %c0_i32_1 = arith.constant 0 : i32
    return %arg0, %c0_i32, %c0_i32_0 : i32, i32, i32
  }
  func.func @transform_2(%arg0: i32) -> (i32, i32, i32) {
    %c0_i32 = arith.constant 0 : i32
    %c0_i32_0 = arith.constant 0 : i32
    %c0_i32_1 = arith.constant 0 : i32
    return %arg0, %c0_i32, %c0_i32_0 : i32, i32, i32
  }
  func.func @transform_3(%arg0: i32) -> (i32, i32, i32) {
    %c0_i32 = arith.constant 0 : i32
    %c0_i32_0 = arith.constant 0 : i32
    %c0_i32_1 = arith.constant 0 : i32
    return %arg0, %c0_i32, %c0_i32_0 : i32, i32, i32
  }
  func.func @transform_4(%arg0: i32) -> (i32, i32, i32) {
    %c0_i32 = arith.constant 0 : i32
    %c0_i32_0 = arith.constant 0 : i32
    %c0_i32_1 = arith.constant 0 : i32
    return %arg0, %c0_i32, %c0_i32_0 : i32, i32, i32
  }
  func.func @transform_5(%arg0: i32) -> (i32, i32, i32, i32) {
    %c0_i32 = arith.constant 0 : i32
    %c0_i32_0 = arith.constant 0 : i32
    %c0_i32_1 = arith.constant 0 : i32
    %c0_i32_2 = arith.constant 0 : i32
    return %arg0, %c0_i32, %c0_i32_0, %c0_i32_1 : i32, i32, i32, i32
  }
}

</mosaic_0001>

<bundles_post_ra>
// kernel: ensemble_forward.1
= control target key start
LH: loop header
LB: loop body
LE: loop exit
PB: predicated region body
PF: predicated region fallthrough
CT: control target
= control target key end

     0   :  { %s1986_s18 = smov 0   ;;  %s2202_s0 = inlined_call_operand.vmem [shape: f32[2,6,8,32], index: 0, kind: input, shape index: {}]   ;;  %s2203_s1 = inlined_call_operand.vmem [shape: f32[2,64,128], index: 1, kind: input, shape index: {}]   ;;  %s2204_s2 = inlined_call_operand.vmem [shape: f32[2,1,128], index: 2, kind: input, shape index: {}]   ;;  %s2205_s3 = inlined_call_operand.vmem [shape: f32[2,32,128], index: 3, kind: input, shape index: {}]   ;;  %s2206_s4 = inlined_call_operand.vmem [shape: f32[2,1,128], index: 4, kind: input, shape index: {}]   ;;  %s2207_s5 = inlined_call_operand.vmem [shape: f32[2,5,8,128], index: 5, kind: output, shape index: {}]  }
   0x1 LB: > { %s1467_s19 = sadd.s32 4294967295, %s1949_s18   ;;  %p1471_p0 = scmp.ge.s32.totalorder %s1949_s18, 1  ;;  %s1949_s18 = sphi %s1986_s18, %s15_s18  }
   0x2   : > { %p223_p1 = scmp.lt.s32.totalorder %s1949_s18, 3 }
   0x4   : > { %p224_p2 = pnand %p1471_p0, %p223_p1 }
   0x5   : > { %p267_p3 = scmp.lt.s32.totalorder (!%p224_p2), %s1467_s19, 1  ;;  %v1951_v0 = vmov (!%p224_p2), 0.0|0.0   ;;  %vm1952_vm0 = vmmov (!%p224_p2), 0   ;;  %v1953_v1 = vmov (!%p224_p2), 0.0   ;;  %vm320_vm1 = vcmask (!%p224_p2), 261120   ;;  %s1954_s6 = smov (!%p224_p2), 64  }
   0x6   : > { %227 = sbr.rel (%p224_p2) target bundleno = 4825 (0x12d9), region = 40  ;;  %1758 = vmatprep.subr.bf16.mxu0 (!%p224_p2), %v1951_v0  ;;  %1605 = vmatprep.mubr.msk.f32.mxu0 (!%p224_p2), %vm1952_vm0, %v1953_v1  ;;  %vm322_vm2 = vcmask (!%p224_p2), 523264   ;;  %s1955_s7 = smov (!%p224_p2), 32  }
   0x7   : > { %1770 = vmatprep.subr.bf16.mxu1 (!%p224_p2), %v1951_v0  ;;  %1624 = vmatprep.mubr.msk.f32.mxu1 (!%p224_p2), %vm1952_vm0, %v1953_v1 }
   0xd   : > { %s2209_s19 = smov (!%p267_p3, %s1467_s19), 1 }
   0xe   : > { %s1508_s20 = sshll.u32 %s2209_s19, 6  ;;  %s1860_s24 = smul.u32 48, %s2209_s19 }
   0xf   : > { %s276_s23 = scalar_lea.vmem %s2203_s1, %s1508_s20  ;;  %s279_s30 = scalar_lea.vmem %s2204_s2, %s2209_s19 }
  0x10   : > { %v293_v2 = vld [vmem:[%s276_s23] sm:$0xff]  ;;  %v294_v3 = vld [vmem:[%s276_s23 + $0x8] sm:$0xff]  ;;  %v295_v4 = vld [vmem:[%s276_s23 + $0x10] sm:$0xff]  ;;  %s2024_s27 = scalar_lea.vmem %s2202_s0, %s1860_s24  ;;  %s1509_s8 = sshll.u32 %s2209_s19, 5 }
  0x11   : > { %v2006_v5 = vpack.c.bf16 %v294_v3, %v293_v2  ;;  %v296_v6 = vld [vmem:[%s276_s23 + $0x18] sm:$0xff]  ;;  %v297_v8 = vld [vmem:[%s276_s23 + $0x20] sm:$0xff]  ;;  %v298_v9 = vld [vmem:[%s276_s23 + $0x28] sm:$0xff]  ;;  %s284_s11 = scalar_lea.vmem %s2205_s3, %s1509_s8  ;;  %s287_s14 = scalar_lea.vmem %s2206_s4, %s2209_s19 }
  0x12   : > { %v2009_v7 = vpack.c.bf16 %v296_v6, %v295_v4  ;;  %v2016_v10 = vpack.c.bf16 %v298_v9, %v297_v8  ;;  %v299_v11 = vld [vmem:[%s276_s23 + $0x30] sm:$0xff]  ;;  %v300_v12 = vld [vmem:[%s276_s23 + $0x38] sm:$0xff]  ;;  %v319_v14 = vld [vmem:[%s2024_s27] sm:$0xff]  ;;  %s1861_s15 = smul.u32 40, %s2209_s19 }
  0x13   : > { %1760 = vmatpush3.bf16.msra.mxu0 %v2006_v5  ;;  %1772 = vmatpush3.bf16.msra.mxu1 %v2006_v5  ;;  %v2027_v13 = vpack.c.bf16 %v300_v12, %v299_v11  ;;  %v321_v15 = vsel %vm320_vm1, %v319_v14, 0.0  ;;  %v2045_v16 = vld [vmem:[%s279_s30] ss:$0 sm:$0xff]  ;;  %v1482_v33 = vld [vmem:[%s2024_s27 + $0x8] sm:$0xff]  ;;  %v1486_v52 = vld [vmem:[%s2024_s27 + $0x10] sm:$0xff] }
  0x14   : > { %1761 = vmatprep.subr.bf16.mxu0 %v1951_v0  ;;  %1773 = vmatprep.subr.bf16.mxu1 %v1951_v0  ;;  %v301_v58 = vld [vmem:[%s284_s11] sm:$0xff]  ;;  %v302_v59 = vld [vmem:[%s284_s11 + $0x8] sm:$0xff]  ;;  %v303_v3 = vld [vmem:[%s284_s11 + $0x10] sm:$0xff]  ;;  %s2192_s20 = scalar_lea.vmem %s2207_s5, %s1861_s15 }
  0x15   : > { %v2080_v60 = vpack.c.bf16 %v302_v59, %v301_v58  ;;  %v304_v4 = vld [vmem:[%s284_s11 + $0x18] sm:$0xff] }
  0x16   : > { %v2087_v6 = vpack.c.bf16 %v304_v4, %v303_v3 }
  0x17   : > { %1763 = vmatpush3.bf16.msra.mxu0 %v2009_v7  ;;  %1775 = vmatpush3.bf16.msra.mxu1 %v2009_v7 }
  0x18   : > { %1764 = vmatprep.subr.bf16.mxu0 %v1951_v0  ;;  %1776 = vmatprep.subr.bf16.mxu1 %v1951_v0 }
  0x1b   : > { %1766 = vmatpush3.bf16.msra.mxu0 %v2016_v10  ;;  %1778 = vmatpush3.bf16.msra.mxu1 %v2016_v10 }
  0x1c   : > { %1767 = vmatprep.subr.bf16.mxu0 %v1951_v0  ;;  %1779 = vmatprep.subr.bf16.mxu1 %v1951_v0 }
  0x1f   : > { %1769 = vmatpush3.bf16.msra.mxu0 %v2027_v13  ;;  %1781 = vmatpush3.bf16.msra.mxu1 %v2027_v13 }
  0x20   : > { %1788 = vmatprep.subr.bf16.mxu1 %v1951_v0  ;;  %1782 = vmatprep.subr.bf16.mxu0 %v1951_v0 }
  0x22   : > { %1606 = vmatmul.mubr.msk.f32.vlgmr.msra.gmra.mrb[0].mxu0 %vm322_vm2, %v321_v15 }
  0x23   : > { %1635 = vmatprep.mubr.msk.f32.mxu0 %vm1952_vm0, %v1953_v1  ;;  %1784 = vmatpush3.bf16.msra.mxu0 %v2080_v60 }
  0x24   : > { %1785 = vmatprep.subr.bf16.mxu0 %v1951_v0 }
  0x27   : > { %1787 = vmatpush3.bf16.msra.mxu0 %v2087_v6 }
  0x28   : > { %1800 = vmatprep.subr.bf16.mxu0 %v1951_v0 }
  0xf5   : > { %v392_v17 = vpop.f32.mrb[0].mxu0 }
  0xf6   : > { %v393_v18 = vadd.f32 %v2045_v16, %v392_v17  ;;  %v1607_v19 = vpop.f32.mrb[1].mxu0 }
  0xf8   : > { %1875 = vtanh.f32 %v393_v18  ;;  %v1481_v21 = vmul.f32 -1.442695, %v393_v18 }
  0xfa   : > { %1877 = vpow2.f32 %v1481_v21 }
 0x102   : > { %v1876_v20 = vpop.eup %1875 }
 0x103   : > { %405 = vrot.lane.b32.xlu0 %v1876_v20, %s1954_s6 }
 0x104   : > { %v1878_v22 = vpop.eup %1877 }
 0x105   : > { %v399_v23 = vadd.f32 1.0, %v1878_v22 }
 0x107   : > { %1879 = vrcp.f32 %v399_v23 }
 0x111   : > { %v1880_v24 = vpop.eup %1879 }
 0x112   : > { %v403_v27 = vmul.f32 0.0, %v1880_v24 }
 0x175   : > { %v406_v25 = vpop.permute.xlu0 %405 }
 0x176   : > { %v408_v26 = vmul.f32 %v1880_v24, %v406_v25 }
 0x178   : > { %410 = vrot.lane.b32.xlu0 %v408_v26, %s1955_s7 }
 0x1ea   : > { %v411_v28 = vpop.permute.xlu0 %410 }
 0x1eb   : > { %v413_v29 = vadd.f32 %v411_v28, %v403_v27 }
 0x1ed   : > { %1881 = vtanh.f32 %v413_v29 }
 0x1f7   : > { %v1882_v30 = vpop.eup %1881 }
 0x1f8   : > { %416 = vrot.lane.b32.xlu1 %v1882_v30, %s1954_s6 }
 0x26a   : > { %v417_v31 = vpop.permute.xlu1 %416 }
 0x26b   : > { %v419_v32 = vmul.f32 %v1880_v24, %v417_v31  ;;  %v1491_v24 = vld [vmem:[%s2024_s27 + $0x18] sm:$0xff] }
 0x26d   : > { %423 = vrot.lane.b32.xlu1 %v419_v32, %s1954_s6 }
 0x2df   : > { %v424_v34 = vpop.permute.xlu1 %423 }
 0x2e0   : > { %v426_v35 = vsel %vm320_vm1, %v1482_v33, %v424_v34 }
 0x2e1   : > { %1625 = vmatmul.mubr.msk.f32.vlgmr.msra.gmra.mrb[0].mxu1 %vm322_vm2, %v426_v35 }
 0x2e2   : > { %1790 = vmatpush3.bf16.msra.mxu1 %v2006_v5  ;;  %1654 = vmatprep.mubr.msk.f32.mxu1 %vm1952_vm0, %v1953_v1 }
 0x2e3   : > { %1791 = vmatprep.subr.bf16.mxu1 %v1951_v0 }
 0x2e6   : > { %1793 = vmatpush3.bf16.msra.mxu1 %v2009_v7 }
 0x2e7   : > { %1794 = vmatprep.subr.bf16.mxu1 %v1951_v0 }
 0x2ea   : > { %1796 = vmatpush3.bf16.msra.mxu1 %v2016_v10 }
 0x2eb   : > { %1797 = vmatprep.subr.bf16.mxu1 %v1951_v0 }
 0x2ee   : > { %1799 = vmatpush3.bf16.msra.mxu1 %v2027_v13 }
 0x2ef   : > { %1818 = vmatprep.subr.bf16.mxu1 %v1951_v0 }
 0x3b4   : > { %v496_v36 = vpop.f32.mrb[0].mxu1 }
 0x3b5   : > { %v497_v37 = vadd.f32 %v2045_v16, %v496_v36  ;;  %v1626_v38 = vpop.f32.mrb[1].mxu1 }
 0x3b7   : > { %1883 = vtanh.f32 %v497_v37  ;;  %v1484_v40 = vmul.f32 -1.442695, %v497_v37 }
 0x3b9   : > { %1885 = vpow2.f32 %v1484_v40 }
 0x3c1   : > { %v1884_v39 = vpop.eup %1883 }
 0x3c2   : > { %509 = vrot.lane.b32.xlu0 %v1884_v39, %s1954_s6 }
 0x3c3   : > { %v1886_v41 = vpop.eup %1885 }
 0x3c4   : > { %v503_v42 = vadd.f32 1.0, %v1886_v41 }
 0x3c6   : > { %1887 = vrcp.f32 %v503_v42 }
 0x3d0   : > { %v1888_v43 = vpop.eup %1887 }
 0x3d1   : > { %v507_v46 = vmul.f32 %v1888_v43, %v413_v29 }
 0x434   : > { %v510_v44 = vpop.permute.xlu0 %509 }
 0x435   : > { %v512_v45 = vmul.f32 %v1888_v43, %v510_v44 }
 0x437   : > { %514 = vrot.lane.b32.xlu1 %v512_v45, %s1955_s7 }
 0x4a9   : > { %v515_v47 = vpop.permute.xlu1 %514 }
 0x4aa   : > { %v517_v48 = vadd.f32 %v515_v47, %v507_v46  ;;  %v1496_v46 = vld [vmem:[%s2024_s27 + $0x20] sm:$0xff] }
 0x4ac   : > { %1889 = vtanh.f32 %v517_v48 }
 0x4b6   : > { %v1890_v49 = vpop.eup %1889 }
 0x4b7   : > { %520 = vrot.lane.b32.xlu0 %v1890_v49, %s1954_s6 }
 0x529   : > { %v521_v50 = vpop.permute.xlu0 %520 }
 0x52a   : > { %v523_v51 = vmul.f32 %v1888_v43, %v521_v50 }
 0x52c   : > { %612 = vrot.lane.b32.xlu1 %v523_v51, %s1954_s6 }
 0x59e   : > { %v613_v53 = vpop.permute.xlu1 %612 }
 0x59f   : > { %v615_v54 = vsel %vm320_vm1, %v1486_v52, %v613_v53 }
 0x5a0   : > { %1655 = vmatmul.mubr.msk.f32.vlgmr.msra.gmra.mrb[2].mxu1 %vm322_vm2, %v615_v54 }
 0x5a1   : > { %1695 = vmatprep.mubr.msk.f32.mxu1 %vm1952_vm0, %v1953_v1  ;;  %1820 = vmatpush3.bf16.msra.mxu1 %v2080_v60 }
 0x5a2   : > { %1821 = vmatprep.subr.bf16.mxu1 %v1951_v0 }
 0x5a5   : > { %1823 = vmatpush3.bf16.msra.mxu1 %v2087_v6 }
 0x5a6   : > { %1824 = vmatprep.subr.bf16.mxu1 %v1951_v0 }
 0x673   : > { %v685_v55 = vpop.f32.mrb[2].mxu1 }
 0x674   : > { %v686_v56 = vadd.f32 %v2045_v16, %v685_v55  ;;  %v1656_v57 = vpop.f32.mrb[3].mxu1 }
 0x676   : > { %1891 = vtanh.f32 %v686_v56  ;;  %v1488_v62 = vmul.f32 -1.442695, %v686_v56 }
 0x678   : > { %1893 = vpow2.f32 %v1488_v62 }
 0x680   : > { %v1892_v61 = vpop.eup %1891 }
 0x681   : > { %698 = vrot.lane.b32.xlu0 %v1892_v61, %s1954_s6 }
 0x682   : > { %v1894_v63 = vpop.eup %1893 }
 0x683   : > { %v692_v2 = vadd.f32 1.0, %v1894_v63 }
 0x685   : > { %1895 = vrcp.f32 %v692_v2 }
 0x68f   : > { %v1896_v8 = vpop.eup %1895 }
 0x690   : > { %v696_v12 = vmul.f32 %v1896_v8, %v517_v48 }
 0x6f3   : > { %v699_v9 = vpop.permute.xlu0 %698 }
 0x6f4   : > { %v701_v11 = vmul.f32 %v1896_v8, %v699_v9 }
 0x6f6   : > { %703 = vrot.lane.b32.xlu1 %v701_v11, %s1955_s7 }
 0x6fa   : > { %525 = vrot.lane.b32.xlu1 %v523_v51, %s1955_s7 }
 0x768   : > { %v704_v14 = vpop.permute.xlu1 %703 }
 0x769   : > { %v706_v15 = vadd.f32 %v704_v14, %v696_v12 }
 0x76b   : > { %1897 = vtanh.f32 %v706_v15 }
 0x76c   : > { %v526_v17 = vpop.permute.xlu1 %525 }
 0x76d   : > { %1636 = vmatmul.mubr.msk.f32.vlgmr.msra.gmra.mrb[2].mxu0 %vm320_vm1, %v526_v17 }
 0x76e   : > { %1802 = vmatpush3.bf16.msra.mxu0 %v2080_v60  ;;  %1665 = vmatprep.mubr.msk.f32.mxu0 %vm1952_vm0, %v1953_v1 }
 0x76f   : > { %1803 = vmatprep.subr.bf16.mxu0 %v1951_v0 }
 0x772   : > { %1805 = vmatpush3.bf16.msra.mxu0 %v2087_v6 }
 0x773   : > { %1806 = vmatprep.subr.bf16.mxu0 %v1951_v0 }
 0x775   : > { %v1898_v18 = vpop.eup %1897 }
 0x776   : > { %709 = vrot.lane.b32.xlu0 %v1898_v18, %s1954_s6 }
 0x7e8   : > { %v710_v19 = vpop.permute.xlu0 %709 }
 0x7e9   : > { %v712_v20 = vmul.f32 %v1896_v8, %v710_v19  ;;  %v1501_v8 = vld [vmem:[%s2024_s27 + $0x28] sm:$0xff] }
 0x7eb   : > { %802 = vrot.lane.b32.xlu1 %v712_v20, %s1954_s6  ;;  %714 = vrot.lane.b32.xlu0 %v712_v20, %s1955_s7 }
 0x840   : > { %v2105_v21 = vpop.f32.mrb[2].mxu0 }
 0x841   : > { %v1637_v22 = vpop.f32.mrb[3].mxu0 }
 0x85d   : > { %v715_v23 = vpop.permute.xlu0 %714  ;;  %v803_v25 = vpop.permute.xlu1 %802 }
 0x85e   : > { %1666 = vmatmul.mubr.msk.f32.vlgmr.msra.gmra.mrb[4].mxu0 %vm320_vm1, %v715_v23  ;;  %v805_v26 = vsel %vm320_vm1, %v1491_v24, %v803_v25  ;;  %v1479_v24 = vld [vmem:[%s287_s14] ss:$0 sm:$0xff] }
 0x85f   : > { %1808 = vmatpush3.bf16.msra.mxu0 %v2006_v5  ;;  %1684 = vmatprep.mubr.msk.f32.mxu0 %vm1952_vm0, %v1953_v1  ;;  %v596_v25 = vadd.f32 %v1479_v24, %v2105_v21 }
 0x860   : > { %1809 = vmatprep.subr.bf16.mxu0 %v1951_v0 }
 0x863   : > { %1811 = vmatpush3.bf16.msra.mxu0 %v2009_v7 }
 0x864   : > { %1812 = vmatprep.subr.bf16.mxu0 %v1951_v0 }
 0x867   : > { %1814 = vmatpush3.bf16.msra.mxu0 %v2016_v10 }
 0x868   : > { %1815 = vmatprep.subr.bf16.mxu0 %v1951_v0 }
 0x86b   : > { %1817 = vmatpush3.bf16.msra.mxu0 %v2027_v13 }
 0x86c   : > { %1836 = vmatprep.subr.bf16.mxu0 %v1951_v0 }
 0x86e   : > { %1685 = vmatmul.mubr.msk.f32.vlgmr.msra.gmra.mrb[6].mxu0 %vm322_vm2, %v805_v26 }
 0x86f   : > { %1838 = vmatpush3.bf16.msra.mxu0 %v2080_v60  ;;  %1725 = vmatprep.mubr.msk.f32.mxu0 %vm1952_vm0, %v1953_v1 }
 0x870   : > { %1839 = vmatprep.subr.bf16.mxu0 %v1951_v0 }
 0x873   : > { %1841 = vmatpush3.bf16.msra.mxu0 %v2087_v6 }
 0x874   : > { %1842 = vmatprep.subr.bf16.mxu0 %v1951_v0 }
 0x931   : > { %v2127_v27 = vpop.f32.mrb[4].mxu0 }
 0x932   : > { %v1667_v28 = vpop.f32.mrb[5].mxu0 }
 0x941   : > { %v875_v29 = vpop.f32.mrb[6].mxu0 }
 0x942   : > { %v876_v30 = vadd.f32 %v2045_v16, %v875_v29  ;;  %v1686_v31 = vpop.f32.mrb[7].mxu0 }
 0x943   : > { %v785_v31 = vadd.f32 %v1479_v24, %v2127_v27 }
 0x944   : > { %1899 = vtanh.f32 %v876_v30  ;;  %v1493_v33 = vmul.f32 -1.442695, %v876_v30 }
 0x946   : > { %1901 = vpow2.f32 %v1493_v33 }
 0x94e   : > { %v1900_v32 = vpop.eup %1899 }
 0x94f   : > { %888 = vrot.lane.b32.xlu0 %v1900_v32, %s1954_s6 }
 0x950   : > { %v1902_v34 = vpop.eup %1901 }
 0x951   : > { %v882_v35 = vadd.f32 1.0, %v1902_v34 }
 0x953   : > { %1903 = vrcp.f32 %v882_v35 }
 0x95d   : > { %v1904_v36 = vpop.eup %1903 }
 0x95e   : > { %v886_v39 = vmul.f32 %v1904_v36, %v706_v15 }
 0x9c1   : > { %v889_v37 = vpop.permute.xlu0 %888 }
 0x9c2   : > { %v891_v38 = vmul.f32 %v1904_v36, %v889_v37 }
 0x9c4   : > { %893 = vrot.lane.b32.xlu1 %v891_v38, %s1955_s7 }
 0xa36   : > { %v894_v40 = vpop.permute.xlu1 %893 }
 0xa37   : > { %v896_v41 = vadd.f32 %v894_v40, %v886_v39 }
 0xa39   : > { %1905 = vtanh.f32 %v896_v41 }
 0xa43   : > { %v1906_v42 = vpop.eup %1905 }
 0xa44   : > { %899 = vrot.lane.b32.xlu0 %v1906_v42, %s1954_s6 }
 0xab6   : > { %v900_v43 = vpop.permute.xlu0 %899 }
 0xab7   : > { %v902_v44 = vmul.f32 %v1904_v36, %v900_v43 }
 0xab9   : > { %992 = vrot.lane.b32.xlu0 %v902_v44, %s1954_s6  ;;  %904 = vrot.lane.b32.xlu1 %v902_v44, %s1955_s7 }
 0xb2b   : > { %v905_v45 = vpop.permute.xlu1 %904  ;;  %v993_v47 = vpop.permute.xlu0 %992 }
 0xb2c   : > { %1696 = vmatmul.mubr.msk.f32.vlgmr.msra.gmra.mrb[4].mxu1 %vm320_vm1, %v905_v45  ;;  %v995_v48 = vsel %vm320_vm1, %v1496_v46, %v993_v47 }
 0xb2d   : > { %1826 = vmatpush3.bf16.msra.mxu1 %v2006_v5  ;;  %1714 = vmatprep.mubr.msk.f32.mxu1 %vm1952_vm0, %v1953_v1 }
 0xb2e   : > { %1827 = vmatprep.subr.bf16.mxu1 %v1951_v0 }
 0xb31   : > { %1829 = vmatpush3.bf16.msra.mxu1 %v2009_v7 }
 0xb32   : > { %1830 = vmatprep.subr.bf16.mxu1 %v1951_v0 }
 0xb35   : > { %1832 = vmatpush3.bf16.msra.mxu1 %v2016_v10 }
 0xb36   : > { %1833 = vmatprep.subr.bf16.mxu1 %v1951_v0 }
 0xb39   : > { %1835 = vmatpush3.bf16.msra.mxu1 %v2027_v13 }
 0xb3a   : > { %1854 = vmatprep.subr.bf16.mxu1 %v1951_v0 }
 0xb3c   : > { %1715 = vmatmul.mubr.msk.f32.vlgmr.msra.gmra.mrb[6].mxu1 %vm322_vm2, %v995_v48 }
 0xb3d   : > { %1856 = vmatpush3.bf16.msra.mxu1 %v2080_v60  ;;  %1755 = vmatprep.mubr.msk.f32.mxu1 %vm1952_vm0, %v1953_v1 }
 0xb3e   : > { %1857 = vmatprep.subr.bf16.mxu1 %v1951_v0 }
 0xb41   : > { %1859 = vmatpush3.bf16.msra.mxu1 %v2087_v6 }
 0xbff   : > { %v2154_v49 = vpop.f32.mrb[4].mxu1 }
 0xc00   : > { %v1697_v50 = vpop.f32.mrb[5].mxu1  ;;  %v975_v26 = vadd.f32 %v1479_v24, %v2154_v49 }
 0xc0f   : > { %v1065_v51 = vpop.f32.mrb[6].mxu1 }
 0xc10   : > { %v1066_v52 = vadd.f32 %v2045_v16, %v1065_v51  ;;  %v1716_v53 = vpop.f32.mrb[7].mxu1 }
 0xc12   : > { %1907 = vtanh.f32 %v1066_v52  ;;  %v1498_v55 = vmul.f32 -1.442695, %v1066_v52 }
 0xc14   : > { %1909 = vpow2.f32 %v1498_v55 }
 0xc1c   : > { %v1908_v54 = vpop.eup %1907 }
 0xc1d   : > { %1078 = vrot.lane.b32.xlu1 %v1908_v54, %s1954_s6 }
 0xc1e   : > { %v1910_v56 = vpop.eup %1909 }
 0xc1f   : > { %v1072_v57 = vadd.f32 1.0, %v1910_v56 }
 0xc21   : > { %1911 = vrcp.f32 %v1072_v57 }
 0xc2b   : > { %v1912_v58 = vpop.eup %1911 }
 0xc2c   : > { %v1076_v61 = vmul.f32 %v1912_v58, %v896_v41 }
 0xc8f   : > { %v1079_v59 = vpop.permute.xlu1 %1078 }
 0xc90   : > { %v1081_v60 = vmul.f32 %v1912_v58, %v1079_v59 }
 0xc92   : > { %1083 = vrot.lane.b32.xlu0 %v1081_v60, %s1955_s7 }
 0xd04   : > { %v1084_v62 = vpop.permute.xlu0 %1083 }
 0xd05   : > { %v1086_v63 = vadd.f32 %v1084_v62, %v1076_v61 }
 0xd07   : > { %1913 = vtanh.f32 %v1086_v63 }
 0xd11   : > { %v1914_v2 = vpop.eup %1913 }
 0xd12   : > { %1089 = vrot.lane.b32.xlu1 %v1914_v2, %s1954_s6 }
 0xd84   : > { %v1090_v3 = vpop.permute.xlu1 %1089 }
 0xd85   : > { %v1092_v4 = vmul.f32 %v1912_v58, %v1090_v3 }
 0xd87   : > { %1182 = vrot.lane.b32.xlu1 %v1092_v4, %s1954_s6  ;;  %1094 = vrot.lane.b32.xlu0 %v1092_v4, %s1955_s7 }
 0xdf9   : > { %v1095_v6 = vpop.permute.xlu0 %1094  ;;  %v1183_v9 = vpop.permute.xlu1 %1182 }
 0xdfa   : > { %1726 = vmatmul.mubr.msk.f32.vlgmr.msra.gmra.mrb[8].mxu0 %vm320_vm1, %v1095_v6  ;;  %v1185_v11 = vsel %vm320_vm1, %v1501_v8, %v1183_v9 }
 0xdfb   : > { %1844 = vmatpush3.bf16.msra.mxu0 %v2006_v5  ;;  %1744 = vmatprep.mubr.msk.f32.mxu0 %vm1952_vm0, %v1953_v1 }
 0xdfc   : > { %1845 = vmatprep.subr.bf16.mxu0 %v1951_v0 }
 0xdff   : > { %1847 = vmatpush3.bf16.msra.mxu0 %v2009_v7 }
 0xe00   : > { %1848 = vmatprep.subr.bf16.mxu0 %v1951_v0 }
 0xe03   : > { %1850 = vmatpush3.bf16.msra.mxu0 %v2016_v10 }
 0xe04   : > { %1851 = vmatprep.subr.bf16.mxu0 %v1951_v0 }
 0xe07   : > { %1853 = vmatpush3.bf16.msra.mxu0 %v2027_v13 }
 0xe0a   : > { %1745 = vmatmul.mubr.msk.f32.vlgmr.msra.gmra.mrb[10].mxu0 %vm322_vm2, %v1185_v11 }
 0xecd   : > { %v1164_v5 = vpop.f32.mrb[8].mxu0 }
 0xece   : > { %v1727_v1 = vpop.f32.mrb[9].mxu0  ;;  %v1165_v28 = vadd.f32 %v1479_v24, %v1164_v5 }
 0xedd   : > { %v1255_v12 = vpop.f32.mrb[10].mxu0 }
 0xede   : > { %v1256_v14 = vadd.f32 %v2045_v16, %v1255_v12  ;;  %v1746_v7 = vpop.f32.mrb[11].mxu0 }
 0xee0   : > { %1915 = vtanh.f32 %v1256_v14  ;;  %v1503_v0 = vmul.f32 -1.442695, %v1256_v14 }
 0xee2   : > { %1917 = vpow2.f32 %v1503_v0 }
 0xeea   : > { %v1916_v15 = vpop.eup %1915 }
 0xeeb   : > { %1268 = vrot.lane.b32.xlu0 %v1916_v15, %s1954_s6 }
 0xeec   : > { %v1918_v10 = vpop.eup %1917 }
 0xeed   : > { %v1262_v17 = vadd.f32 1.0, %v1918_v10 }
 0xeef   : > { %1919 = vrcp.f32 %v1262_v17 }
 0xef9   : > { %v1920_v13 = vpop.eup %1919 }
 0xefa   : > { %v1266_v20 = vmul.f32 %v1920_v13, %v1086_v63 }
 0xf5d   : > { %v1269_v18 = vpop.permute.xlu0 %1268 }
 0xf5e   : > { %v1271_v19 = vmul.f32 %v1920_v13, %v1269_v18 }
 0xf60   : > { %1273 = vrot.lane.b32.xlu1 %v1271_v19, %s1955_s7 }
 0xfd2   : > { %v1274_v22 = vpop.permute.xlu1 %1273 }
 0xfd3   : > { %v1276_v23 = vadd.f32 %v1274_v22, %v1266_v20 }
 0xfd5   : > { %1921 = vtanh.f32 %v1276_v23 }
 0xfdf   : > { %v1922_v16 = vpop.eup %1921 }
 0xfe0   : > { %1279 = vrot.lane.b32.xlu0 %v1922_v16, %s1954_s6 }
 0xfff   : > { %599 = vmax.xlane.f32.xlu0 %v596_v25 }
0x1003   : > { %978 = vmax.xlane.f32.xlu0 %v975_v26 }
0x1007   : > { %1168 = vmax.xlane.f32.xlu0 %v1165_v28 }
0x1052   : > { %v1280_v29 = vpop.permute.xlu0 %1279 }
0x1053   : > { %v1282_v30 = vmul.f32 %v1920_v13, %v1280_v29 }
0x1055   : > { %1284 = vrot.lane.b32.xlu1 %v1282_v30, %s1955_s7 }
0x1079   : > { %788 = vmax.xlane.f32.xlu1 %v785_v31 }
0x108c   : > { %v600_v32 = vpop.xlane.xlu0 %599 }
0x108d   : > { %v601_v33 = vsub.f32 %v596_v25, %v600_v32 }
0x108f   : > { %v602_v34 = vmul.f32 1.442695, %v601_v33 }
0x1090   : > { %v979_v35 = vpop.xlane.xlu0 %978 }
0x1091   : > { %1923 = vpow2.f32 %v602_v34  ;;  %v980_v21 = vsub.f32 %v975_v26, %v979_v35 }
0x1093   : > { %v981_v36 = vmul.f32 1.442695, %v980_v21 }
0x1094   : > { %v1169_v40 = vpop.xlane.xlu0 %1168 }
0x1095   : > { %1925 = vpow2.f32 %v981_v36  ;;  %v1170_v50 = vsub.f32 %v1165_v28, %v1169_v40 }
0x1097   : > { %v1171_v52 = vmul.f32 1.442695, %v1170_v50 }
0x109b   : > { %v1924_v37 = vpop.eup %1923 }
0x109c   : > { %604 = vadd.xlane.f32.xlu0 %v1924_v37 }
0x109f   : > { %v1926_v38 = vpop.eup %1925 }
0x10a0   : > { %983 = vadd.xlane.f32.xlu0 %v1926_v38 }
0x10c7   : > { %v1285_v39 = vpop.permute.xlu1 %1284 }
0x10c8   : > { %1756 = vmatmul.mubr.msk.f32.vlgmr.msra.gmra.mrb[8].mxu1 %vm320_vm1, %v1285_v39 }
0x1106   : > { %v789_v48 = vpop.xlane.xlu1 %788 }
0x1107   : > { %v790_v49 = vsub.f32 %v785_v31, %v789_v48 }
0x1109   : > { %v791_v51 = vmul.f32 1.442695, %v790_v49 }
0x1129   : > { %v605_v41 = vpop.xlane.xlu0 %604 }
0x112a   : > { %1927 = vlog2.f32 %v605_v41 }
0x112d   : > { %v984_v27 = vpop.xlane.xlu0 %983 }
0x112e   : > { %1929 = vlog2.f32 %v984_v27 }
0x112f   : > { %1931 = vpow2.f32 %v791_v51 }
0x1130   : > { %1933 = vpow2.f32 %v1171_v52 }
0x1134   : > { %v1928_v42 = vpop.eup %1927 }
0x1135   : > { %v607_v43 = vmul.f32 0.6931472, %v1928_v42 }
0x1137   : > { %v608_v44 = vsub.f32 %v601_v33, %v607_v43 }
0x1138   : > { %v1930_v45 = vpop.eup %1929 }
0x1139   : > { %609 = vst [vmem:[%s2192_s20] sm:$0xff] %v608_v44  ;;  %v986_v46 = vmul.f32 0.6931472, %v1930_v45  ;;  %v1932_v56 = vpop.eup %1931 }
0x113a   : > { %v1934_v57 = vpop.eup %1933 }
0x113b   : > { %v987_v47 = vsub.f32 %v980_v21, %v986_v46 }
0x113d   : > { %1495 = vst [vmem:[%s2192_s20 + $0x10] sm:$0xff] %v987_v47 }
0x119b   : > { %v1354_v53 = vpop.f32.mrb[8].mxu1 }
0x119c   : > { %v1355_v54 = vadd.f32 %v1479_v24, %v1354_v53  ;;  %v1757_v55 = vpop.f32.mrb[9].mxu1 }
0x119e   : > { %1358 = vmax.xlane.f32.xlu1 %v1355_v54 }
0x11a2   : > { %793 = vadd.xlane.f32.xlu1 %v1932_v56 }
0x11a6   : > { %1173 = vadd.xlane.f32.xlu1 %v1934_v57 }
0x122b   : > { %v1359_v58 = vpop.xlane.xlu1 %1358 }
0x122c   : > { %v1360_v59 = vsub.f32 %v1355_v54, %v1359_v58 }
0x122e   : > { %v1361_v60 = vmul.f32 1.442695, %v1360_v59 }
0x122f   : > { %v794_v61 = vpop.xlane.xlu1 %793 }
0x1230   : > { %1935 = vpow2.f32 %v1361_v60 }
0x1231   : > { %1937 = vlog2.f32 %v794_v61 }
0x1233   : > { %v1174_v62 = vpop.xlane.xlu1 %1173 }
0x1234   : > { %1939 = vlog2.f32 %v1174_v62 }
0x123a   : > { %v1936_v63 = vpop.eup %1935 }
0x123b   : > { %v1938_v2 = vpop.eup %1937  ;;  %1363 = vadd.xlane.f32.xlu0 %v1936_v63 }
0x123c   : > { %v796_v3 = vmul.f32 0.6931472, %v1938_v2 }
0x123e   : > { %v1940_v4 = vpop.eup %1939  ;;  %v797_v6 = vsub.f32 %v790_v49, %v796_v3 }
0x123f   : > { %v1176_v8 = vmul.f32 0.6931472, %v1940_v4 }
0x1240   : > { %1490 = vst [vmem:[%s2192_s20 + $0x8] sm:$0xff] %v797_v6 }
0x1241   : > { %v1177_v9 = vsub.f32 %v1170_v50, %v1176_v8 }
0x1243   : > { %1500 = vst [vmem:[%s2192_s20 + $0x18] sm:$0xff] %v1177_v9 }
0x12c8   : > { %v1364_v11 = vpop.xlane.xlu0 %1363 }
0x12c9   : > { %1941 = vlog2.f32 %v1364_v11 }
0x12d3   : > { %v1942_v5 = vpop.eup %1941 }
0x12d4   : > { %v1366_v1 = vmul.f32 0.6931472, %v1942_v5 }
0x12d6   : > { %v1367_v12 = vsub.f32 %v1360_v59, %v1366_v1 }
0x12d8   : > { %1505 = vst [vmem:[%s2192_s20 + $0x20] sm:$0xff] %v1367_v12 }
0x12d9 PF: > { %s15_s18 = sadd.s32 1, %s1949_s18  }
0x12da   : > { %p12_p4 = scmp.ge.s32.totalorder %s15_s18, 4  }
0x12dc   :  { %14 = sbr.rel (!%p12_p4) target bundleno = 1 (0x1), region = 91 }

</bundles_post_ra>
